<compile_context>
chip_gen: v7x
topology: tpu7x:2x2x1
jax: 0.10.0
libtpu: 0.0.40
codegen_flags: <defaults>
</compile_context>

<pallas_src>
import functools

import jax
import jax.numpy as jnp
from jax import lax
from jax.experimental import pallas as pl
from jax.experimental.pallas import tpu as pltpu

EPS = 1e-5                    # nn.BatchNorm2d default eps
K = 4                         # kernel size (h == w => KERNEL_SIZE == (4, 4))
GEMM_DTYPE = jnp.bfloat16     # MXU input dtype; accumulation is float32.


def _round_up(x, m):
    return (x + m - 1) // m * m


# ---------------------------------------------------------------------------
# Pallas kernels
# ---------------------------------------------------------------------------
def _gemm_kernel(x_ref, w_ref, o_ref, acc_ref):
    """Tiled GEMM; grid = (row tiles, col tiles, K tiles)."""
    @pl.when(pl.program_id(2) == 0)
    def _init():
        acc_ref[...] = jnp.zeros_like(acc_ref)

    acc_ref[...] += jnp.dot(x_ref[...], w_ref[...],
                            preferred_element_type=jnp.float32)

    @pl.when(pl.program_id(2) == pl.num_programs(2) - 1)
    def _finalize():
        o_ref[...] = acc_ref[...].astype(o_ref.dtype)


def _gemm_stats_kernel(x_ref, w_ref, o_ref, stats_ref, acc_ref):
    """Tiled GEMM + per-row-tile partial BN statistics (sum, sum-of-squares
    per output channel) so batch statistics stay exact under row tiling."""
    @pl.when(pl.program_id(2) == 0)
    def _init():
        acc_ref[...] = jnp.zeros_like(acc_ref)

    acc_ref[...] += jnp.dot(x_ref[...], w_ref[...],
                            preferred_element_type=jnp.float32)

    @pl.when(pl.program_id(2) == pl.num_programs(2) - 1)
    def _finalize():
        y = acc_ref[...]
        o_ref[...] = y.astype(o_ref.dtype)
        tn = y.shape[1]
        s = jnp.broadcast_to(jnp.sum(y, axis=0, keepdims=True), (8, tn))
        ss = jnp.broadcast_to(jnp.sum(y * y, axis=0, keepdims=True), (8, tn))
        row = lax.broadcasted_iota(jnp.int32, (8, tn), 0)
        stats_ref[...] = jnp.where(row == 0, s,
                                   jnp.where(row == 1, ss,
                                             jnp.zeros_like(s)))


def _bn_relu_kernel(y_ref, stats_ref, g_ref, b_ref, o_ref, *, inv_count, eps):
    """Second BN phase: (y - mean) * rsqrt(var + eps) * gamma + beta, ReLU."""
    mean = stats_ref[0:1, :] * inv_count
    var = jnp.maximum(stats_ref[1:2, :] * inv_count - mean * mean, 0.0)
    scale = g_ref[...] * lax.rsqrt(var + eps)
    shift = b_ref[...] - mean * scale
    o_ref[...] = jnp.maximum(y_ref[...] * scale + shift, 0.0)


# ---------------------------------------------------------------------------
# Pallas-call wrappers
# ---------------------------------------------------------------------------
def _pallas_gemm(x, w, *, with_stats, tm=512, tn=256, tk=512):
    """Tiled GEMM (bf16 in / f32 acc) with zero padding to aligned tiles.

    Returns (y (Rp, Cp) f32, stats (8, Cp) f32 [sum; sumsq] or None).
    """
    R, Kd = x.shape
    _, C = w.shape
    tm = min(tm, _round_up(R, 16))      # sublane-aligned for bf16 (16) / f32 (8)
    tn = min(tn, _round_up(C, 128))     # lane-aligned
    tk = min(tk, _round_up(Kd, 128))
    Rp, Kp, Cp = _round_up(R, tm), _round_up(Kd, tk), _round_up(C, tn)

    xb = x.astype(GEMM_DTYPE)
    wb = w.astype(GEMM_DTYPE)
    if (Rp, Kp) != (R, Kd):
        xb = jnp.pad(xb, ((0, Rp - R), (0, Kp - Kd)))
    if (Kp, Cp) != (Kd, C):
        wb = jnp.pad(wb, ((0, Kp - Kd), (0, Cp - C)))

    nm, nn, nk = Rp // tm, Cp // tn, Kp // tk
    common = dict(
        grid=(nm, nn, nk),
        in_specs=[pl.BlockSpec((tm, tk), lambda i, j, k: (i, k)),
                  pl.BlockSpec((tk, tn), lambda i, j, k: (k, j))],
        scratch_shapes=[pltpu.VMEM((tm, tn), jnp.float32)],
        compiler_params=pltpu.CompilerParams(
            dimension_semantics=("parallel", "parallel", "arbitrary")),
    )

    if with_stats:
        y, st = pl.pallas_call(
            _gemm_stats_kernel,
            out_shape=(jax.ShapeDtypeStruct((Rp, Cp), jnp.float32),
                       jax.ShapeDtypeStruct((nm * 8, Cp), jnp.float32)),
            out_specs=(pl.BlockSpec((tm, tn), lambda i, j, k: (i, j)),
                       pl.BlockSpec((8, tn), lambda i, j, k: (i, j))),
            **common,
        )(xb, wb)
        st = jnp.sum(st.reshape(nm, 8, Cp), axis=0)      # (8, Cp)
        return y, st

    y = pl.pallas_call(
        _gemm_kernel,
        out_shape=jax.ShapeDtypeStruct((Rp, Cp), jnp.float32),
        out_specs=pl.BlockSpec((tm, tn), lambda i, j, k: (i, j)),
        **common,
    )(xb, wb)
    return y, None


def _pallas_bn_relu(y, stats, gamma, beta, *, count, tr=512):
    """Apply batch-norm (from precomputed sum/sumsq) + ReLU, tiled over rows."""
    R, Cp = y.shape
    C = gamma.shape[0]
    tr = min(tr, _round_up(R, 8))
    Rp = _round_up(R, tr)
    if Rp != R:
        y = jnp.pad(y, ((0, Rp - R), (0, 0)))
    g = jnp.pad(gamma.astype(jnp.float32), (0, Cp - C)).reshape(1, Cp)
    b = jnp.pad(beta.astype(jnp.float32), (0, Cp - C)).reshape(1, Cp)
    kern = functools.partial(_bn_relu_kernel, inv_count=1.0 / float(count),
                             eps=EPS)
    out = pl.pallas_call(
        kern,
        out_shape=jax.ShapeDtypeStruct((Rp, Cp), jnp.float32),
        grid=(Rp // tr,),
        in_specs=[pl.BlockSpec((tr, Cp), lambda i: (i, 0)),
                  pl.BlockSpec((8, Cp), lambda i: (0, 0)),
                  pl.BlockSpec((1, Cp), lambda i: (0, 0)),
                  pl.BlockSpec((1, Cp), lambda i: (0, 0))],
        out_specs=pl.BlockSpec((tr, Cp), lambda i: (i, 0)),
        compiler_params=pltpu.CompilerParams(
            dimension_semantics=("parallel",)),
    )(y, stats, g, b)
    return out[:R]


# ---------------------------------------------------------------------------
# Host-side glue: conv-transpose -> GEMM layouts (pure data movement)
# ---------------------------------------------------------------------------
def _stride1_patches_weight(x, w_t, pad):
    """stride-1 conv-T == pad by (K-1-pad) + correlate with flipped kernel."""
    N, H, W, C = x.shape
    pw = K - 1 - pad
    h_out = H - 1 - 2 * pad + K
    w_out = W - 1 - 2 * pad + K
    xp = jnp.pad(x, ((0, 0), (pw, pw), (pw, pw), (0, 0)))
    cols = []
    for ky in range(K):
        for kx in range(K):
            cols.append(xp[:, ky:ky + h_out, kx:kx + w_out, :])
    patches = jnp.stack(cols, axis=3).reshape(N * h_out * w_out, K * K * C)
    wf = w_t[:, :, ::-1, ::-1]                         # spatial flip
    w_mat = wf.transpose(2, 3, 0, 1).reshape(K * K * C, w_t.shape[1])
    return patches, w_mat, h_out, w_out


# Sub-pixel decomposition of a stride-2, pad-1, 4x4 transposed convolution:
# each output phase r in {0, 1} along an axis touches the input at exactly
# two taps.  Entries are (offset into the 1-padded input, kernel index).
_PHASE_TAPS = {0: ((1, 1), (0, 3)),     # even output rows / cols
               1: ((2, 0), (1, 2))}     # odd  output rows / cols


def _phase_patches_weight(xp, w_t, ry, rx, H, W):
    """Patches / weight for output phase (ry, rx) of a stride-2 conv-T.
    xp is the input padded by 1 pixel on each spatial side."""
    N = xp.shape[0]
    C = xp.shape[3]
    cols, wrows = [], []
    for oy, ky in _PHASE_TAPS[ry]:
        for ox, kx in _PHASE_TAPS[rx]:
            cols.append(xp[:, oy:oy + H, ox:ox + W, :])
            wrows.append(w_t[:, :, ky, kx])            # (Cin, Cout)
    patches = jnp.stack(cols, axis=3).reshape(N * H * W, 4 * C)
    w_mat = jnp.concatenate(wrows, axis=0)             # (4*Cin, Cout)
    return patches, w_mat


def _interleave_phases(ph):
    """ph[ry][rx]: (N, H, W, C)  ->  (N, 2H, 2W, C)  (pixel shuffle)."""
    stacked = jnp.stack([jnp.stack(ph[0], axis=0),
                         jnp.stack(ph[1], axis=0)], axis=0)   # (2,2,N,H,W,C)
    out = jnp.transpose(stacked, (2, 3, 0, 4, 1, 5))          # (N,H,ry,W,rx,C)
    n, hh, _, ww, _, c = out.shape
    return out.reshape(n, 2 * hh, 2 * ww, c)


# ---------------------------------------------------------------------------
# Layer / forward
# ---------------------------------------------------------------------------
def _convt_layer(x, w_t, gamma, beta, stride, pad, bn_relu):
    N, Hin, Win, _ = x.shape
    c_out = w_t.shape[1]

    if stride == 1:
        patches, w_mat, h_out, w_out = _stride1_patches_weight(x, w_t, pad)
        rows = N * h_out * w_out
        y, st = _pallas_gemm(patches, w_mat, with_stats=bn_relu)
        y = y[:rows]
        if bn_relu:
            y = _pallas_bn_relu(y, st, gamma, beta, count=rows)
        return y[:, :c_out].reshape(N, h_out, w_out, c_out)

    assert stride == 2 and pad == 1
    h_out, w_out = 2 * Hin, 2 * Win
    rows_ph = N * Hin * Win
    xp = jnp.pad(x, ((0, 0), (1, 1), (1, 1), (0, 0)))
    phases, st_sum = [], None
    for ry in (0, 1):
        row_ph = []
        for rx in (0, 1):
            p, wm = _phase_patches_weight(xp, w_t, ry, rx, Hin, Win)
            y, st = _pallas_gemm(p, wm, with_stats=bn_relu)
            cp = y.shape[1]
            if bn_relu:
                st_sum = st if st_sum is None else st_sum + st
            row_ph.append(y[:rows_ph].reshape(N, Hin, Win, cp))
        phases.append(row_ph)
    y_full = _interleave_phases(phases)                # (N, h_out, w_out, Cp)
    if bn_relu:
        rows = N * h_out * w_out
        cp = y_full.shape[-1]
        y2 = _pallas_bn_relu(y_full.reshape(rows, cp), st_sum, gamma, beta,
                             count=rows)
        return y2[:, :c_out].reshape(N, h_out, w_out, c_out)
    return y_full[..., :c_out]


@functools.partial(jax.jit,
                   static_argnames=("cfg", "h", "w", "nc", "sample_rate"))
def dcgan_g_forward(z_nchw, params, *, cfg, h, w, nc, sample_rate):
    x = jnp.transpose(z_nchw, (0, 2, 3, 1)).astype(jnp.float32)   # NHWC
    for (w_t, gamma, beta), (stride, pad, bn_relu) in zip(params, cfg):
        x = _convt_layer(x, w_t, gamma, beta, stride, pad, bn_relu)
    # match: output.view(-1, nc, sr, h, w).permute(0, 1, 3, 4, 2)
    n = x.shape[0]
    out = x.reshape(n, h, w, nc, sample_rate)
    return jnp.transpose(out, (0, 3, 1, 2, 4))


# ---------------------------------------------------------------------------
# Parameter construction (mirrors DCGAN_G.__init__)
# ---------------------------------------------------------------------------
def build_params(key, h, w, nz, nc, ngf, sample_rate):
    assert h == w and h % 16 == 0
    isize = h
    cngf, tisize = ngf // 2, 4
    while tisize != isize:
        cngf *= 2
        tisize *= 2

    keys = jax.random.split(key, 16)
    ki = [0]

    def conv_w(cin, cout):
        wt = 0.05 * jax.random.normal(keys[ki[0]], (cin, cout, K, K),
                                      jnp.float32)
        ki[0] += 1
        return wt

    layers = []
    layers.append(dict(w=conv_w(nz, cngf),
                       gamma=jnp.ones((cngf,), jnp.float32),
                       beta=jnp.zeros((cngf,), jnp.float32),
                       stride=1, pad=0, bn_relu=True))
    csize = 4
    while csize < isize // 2:
        layers.append(dict(w=conv_w(cngf, cngf // 2),
                           gamma=jnp.ones((cngf // 2,), jnp.float32),
                           beta=jnp.zeros((cngf // 2,), jnp.float32),
                           stride=2, pad=1, bn_relu=True))
        cngf //= 2
        csize *= 2
    layers.append(dict(w=conv_w(cngf, nc * sample_rate),
                       gamma=None, beta=None,
                       stride=2, pad=1, bn_relu=False))
    return layers


# ---------------------------------------------------------------------------
# Pure-JAX reference (correctness check only)
# ---------------------------------------------------------------------------
def ref_forward(z_nchw, layers, *, h, w, nc, sample_rate):
    def convt(x, wt, stride, pad):
        wc = jnp.transpose(wt[:, :, ::-1, ::-1], (1, 0, 2, 3))   # OIHW, flipped
        return lax.conv_general_dilated(
            x, wc, window_strides=(1, 1),
            padding=[(K - 1 - pad, K - 1 - pad)] * 2,
            lhs_dilation=(stride, stride),
            dimension_numbers=('NCHW', 'OIHW', 'NCHW'),
            precision=lax.Precision.HIGHEST)

    def bn_relu(x, g, b):
        mean = jnp.mean(x, axis=(0, 2, 3), keepdims=True)
        var = jnp.mean((x - mean) ** 2, axis=(0, 2, 3), keepdims=True)
        y = (x - mean) * lax.rsqrt(var + EPS)
        y = y * g.reshape(1, -1, 1, 1) + b.reshape(1, -1, 1, 1)
        return jnp.maximum(y, 0.0)

    x = z_nchw.astype(jnp.float32)
    for lyr in layers:
        x = convt(x, lyr['w'], lyr['stride'], lyr['pad'])
        if lyr['bn_relu']:
            x = bn_relu(x, lyr['gamma'], lyr['beta'])
    n = x.shape[0]
    x = x.reshape(n, nc, sample_rate, h, w)
    return jnp.transpose(x, (0, 1, 3, 4, 2))


if __name__ == "__main__":
    N, H, W = 2, 16, 16
    NZ, NC, NGF, SR = 8, 4, 8, 8

    key = jax.random.PRNGKey(0)
    kz, kp = jax.random.split(key)
    z = jax.random.normal(kz, (N, NZ, 1, 1), jnp.float32)
    layers = build_params(kp, H, W, NZ, NC, NGF, SR)

    params = tuple((l['w'], l['gamma'], l['beta']) for l in layers)
    cfg = tuple((l['stride'], l['pad'], l['bn_relu']) for l in layers)

    out = dcgan_g_forward(z, params, cfg=cfg, h=H, w=W, nc=NC, sample_rate=SR)
    out = jax.block_until_ready(out)
    assert out.shape == (N, NC, H, W, SR), out.shape

    ref = jax.block_until_ready(
        ref_forward(z, layers, h=H, w=W, nc=NC, sample_rate=SR))
    err = jnp.abs(out - ref)
    max_err = float(jnp.max(err))
    mean_err = float(jnp.mean(err))
    # bf16 MXU inputs (with f32 accumulation) widen the tolerance slightly
    # relative to the all-f32 HIGHEST-precision reference.
    assert max_err < 3e-2, f"max mismatch vs reference: {max_err}"
    assert mean_err < 5e-3, f"mean mismatch vs reference: {mean_err}"

    print("KERNEL_OK")
</pallas_src>

<mosaic_0001>
module attributes {stable_mosaic.version = 11 : i64} {
  func.func @_gemm_stats_kernel(%arg0: i32, %arg1: i32, %arg2: i32, %arg3: memref<32x128xbf16, #tpu.memory_space<vmem>>, %arg4: memref<128x128xbf16, #tpu.memory_space<vmem>>, %arg5: memref<32x128xf32, #tpu.memory_space<vmem>>, %arg6: memref<8x128xf32, #tpu.memory_space<vmem>>, %arg7: memref<32x128xf32, #tpu.memory_space<vmem>>) attributes {dimension_semantics = [#tpu.dimension_semantics<parallel>, #tpu.dimension_semantics<parallel>, #tpu.dimension_semantics<arbitrary>], iteration_bounds = array<i64: 1, 1, 1>, scalar_prefetch = 0 : i64, scratch_operands = 1 : i64, tpu.core_type = #tpu.core_type<tc>, window_params = [{transform_indices = @transform_0, window_bounds = array<i64: 32, 128>}, {transform_indices = @transform_1, window_bounds = array<i64: 128, 128>}, {transform_indices = @transform_2, window_bounds = array<i64: 32, 128>}, {transform_indices = @transform_3, window_bounds = array<i64: 8, 128>}]} {
    %c0_i32 = arith.constant 0 : i32
    %0 = arith.cmpi eq, %arg2, %c0_i32 : i32
    %1 = arith.extui %0 : i1 to i32
    %c0_i32_0 = arith.constant 0 : i32
    %2 = arith.cmpi ne, %1, %c0_i32_0 : i32
    scf.if %2 {
      %cst_10 = arith.constant 0.000000e+00 : f32
      %12 = vector.broadcast %cst_10 : f32 to vector<32x128xf32>
      %c0_11 = arith.constant 0 : index
      %c0_12 = arith.constant 0 : index
      %13 = vector.load %arg7[%c0_11, %c0_12] : memref<32x128xf32, #tpu.memory_space<vmem>>, vector<32x128xf32>
      tpu.vector_store %arg7[%c0_11, %c0_12], %12 {strides = array<i32>} : memref<32x128xf32, #tpu.memory_space<vmem>>, vector<32x128xf32>,
    } else {
    }
    %c0 = arith.constant 0 : index
    %c0_1 = arith.constant 0 : index
    %3 = vector.load %arg7[%c0, %c0_1] : memref<32x128xf32, #tpu.memory_space<vmem>>, vector<32x128xf32>
    %c0_2 = arith.constant 0 : index
    %c0_3 = arith.constant 0 : index
    %4 = vector.load %arg3[%c0_2, %c0_3] : memref<32x128xbf16, #tpu.memory_space<vmem>>, vector<32x128xbf16>
    %c0_4 = arith.constant 0 : index
    %c0_5 = arith.constant 0 : index
    %5 = vector.load %arg4[%c0_4, %c0_5] : memref<128x128xbf16, #tpu.memory_space<vmem>>, vector<128x128xbf16>
    %cst = arith.constant dense<0.000000e+00> : vector<32x128xf32>
    %6 = tpu.matmul %4, %5, %cst {dimension_numbers = #tpu.dot_dimension_numbers<[1], [0], [0], [1], [0, 0, 1, 1], [], []>} : vector<32x128xbf16>, vector<128x128xbf16>, vector<32x128xf32> -> vector<32x128xf32>
    %7 = arith.addf %3, %6 : vector<32x128xf32>
    %c0_6 = arith.constant 0 : index
    %c0_7 = arith.constant 0 : index
    %8 = vector.load %arg7[%c0_6, %c0_7] : memref<32x128xf32, #tpu.memory_space<vmem>>, vector<32x128xf32>
    tpu.vector_store %arg7[%c0_6, %c0_7], %7 {strides = array<i32>} : memref<32x128xf32, #tpu.memory_space<vmem>>, vector<32x128xf32>,
    %c0_i32_8 = arith.constant 0 : i32
    %9 = arith.cmpi eq, %arg2, %c0_i32_8 : i32
    %10 = arith.extui %9 : i1 to i32
    %c0_i32_9 = arith.constant 0 : i32
    %11 = arith.cmpi ne, %10, %c0_i32_9 : i32
    scf.if %11 {
      %c0_10 = arith.constant 0 : index
      %c0_11 = arith.constant 0 : index
      %12 = vector.load %arg7[%c0_10, %c0_11] : memref<32x128xf32, #tpu.memory_space<vmem>>, vector<32x128xf32>
      %c0_12 = arith.constant 0 : index
      %c0_13 = arith.constant 0 : index
      %13 = vector.load %arg5[%c0_12, %c0_13] : memref<32x128xf32, #tpu.memory_space<vmem>>, vector<32x128xf32>
      tpu.vector_store %arg5[%c0_12, %c0_13], %12 {strides = array<i32>} : memref<32x128xf32, #tpu.memory_space<vmem>>, vector<32x128xf32>,
      %cst_14 = arith.constant dense<0.000000e+00> : vector<128xf32>
      %14 = vector.multi_reduction <add>, %12, %cst_14 [0] : vector<32x128xf32> to vector<128xf32>
      %15 = vector.shape_cast %14 : vector<128xf32> to vector<1x128xf32>
      %16 = vector.shape_cast %15 : vector<1x128xf32> to vector<1x128xf32>
      %17 = vector.broadcast %16 : vector<1x128xf32> to vector<8x128xf32>
      %18 = arith.mulf %12, %12 : vector<32x128xf32>
      %cst_15 = arith.constant dense<0.000000e+00> : vector<128xf32>
      %19 = vector.multi_reduction <add>, %18, %cst_15 [0] : vector<32x128xf32> to vector<128xf32>
      %20 = vector.shape_cast %19 : vector<128xf32> to vector<1x128xf32>
      %21 = vector.shape_cast %20 : vector<1x128xf32> to vector<1x128xf32>
      %22 = vector.broadcast %21 : vector<1x128xf32> to vector<8x128xf32>
      %23 = tpu.iota {dimensions = array<i32: 0>} : vector<8x128xi32>
      %c0_i32_16 = arith.constant 0 : i32
      %24 = vector.broadcast %c0_i32_16 : i32 to vector<8x128xi32>
      %25 = arith.cmpi eq, %23, %24 : vector<8x128xi32>
      %c1_i32 = arith.constant 1 : i32
      %26 = vector.broadcast %c1_i32 : i32 to vector<8x128xi32>
      %27 = arith.cmpi eq, %23, %26 : vector<8x128xi32>
      %cst_17 = arith.constant 0.000000e+00 : f32
      %28 = vector.broadcast %cst_17 : f32 to vector<8x128xf32>
      %29 = arith.select %27, %22, %28 : vector<8x128xi1>, vector<8x128xf32>
      %30 = arith.select %25, %17, %29 : vector<8x128xi1>, vector<8x128xf32>
      %c0_18 = arith.constant 0 : index
      %c0_19 = arith.constant 0 : index
      %31 = vector.load %arg6[%c0_18, %c0_19] : memref<8x128xf32, #tpu.memory_space<vmem>>, vector<8x128xf32>
      tpu.vector_store %arg6[%c0_18, %c0_19], %30 {strides = array<i32>} : memref<8x128xf32, #tpu.memory_space<vmem>>, vector<8x128xf32>,
    } else {
    }
    return
  }
  func.func @transform_0(%arg0: i32, %arg1: i32, %arg2: i32) -> (i32, i32) {
    %c0_i32 = arith.constant 0 : i32
    return %arg0, %arg2 : i32, i32
  }
  func.func @transform_1(%arg0: i32, %arg1: i32, %arg2: i32) -> (i32, i32) {
    %c0_i32 = arith.constant 0 : i32
    return %arg2, %arg1 : i32, i32
  }
  func.func @transform_2(%arg0: i32, %arg1: i32, %arg2: i32) -> (i32, i32) {
    %c0_i32 = arith.constant 0 : i32
    return %arg0, %arg1 : i32, i32
  }
  func.func @transform_3(%arg0: i32, %arg1: i32, %arg2: i32) -> (i32, i32) {
    %c0_i32 = arith.constant 0 : i32
    return %arg0, %arg1 : i32, i32
  }
}

module attributes {stable_mosaic.version = 11 : i64} {
  func.func @_bn_relu_kernel(%arg0: i32, %arg1: memref<32x128xf32, #tpu.memory_space<vmem>>, %arg2: memref<8x128xf32, #tpu.memory_space<vmem>>, %arg3: memref<1x128xf32, #tpu.memory_space<vmem>>, %arg4: memref<1x128xf32, #tpu.memory_space<vmem>>, %arg5: memref<32x128xf32, #tpu.memory_space<vmem>>) attributes {dimension_semantics = [#tpu.dimension_semantics<parallel>], iteration_bounds = array<i64: 1>, scalar_prefetch = 0 : i64, scratch_operands = 0 : i64, tpu.core_type = #tpu.core_type<tc>, window_params = [{transform_indices = @transform_0, window_bounds = array<i64: 32, 128>}, {pipeline_mode = #tpu.pipeline_mode<synchronous>, transform_indices = @transform_1, window_bounds = array<i64: 8, 128>}, {pipeline_mode = #tpu.pipeline_mode<synchronous>, transform_indices = @transform_2, window_bounds = array<i64: 1, 128>}, {pipeline_mode = #tpu.pipeline_mode<synchronous>, transform_indices = @transform_3, window_bounds = array<i64: 1, 128>}, {transform_indices = @transform_4, window_bounds = array<i64: 32, 128>}]} {
    %c0 = arith.constant 0 : index
    %c0_0 = arith.constant 0 : index
    %0 = vector.load %arg2[%c0, %c0_0] : memref<8x128xf32, #tpu.memory_space<vmem>>, vector<1x128xf32>
    %cst = arith.constant 3.125000e-02 : f32
    %1 = vector.broadcast %cst : f32 to vector<1x128xf32>
    %2 = arith.mulf %0, %1 : vector<1x128xf32>
    %c1 = arith.constant 1 : index
    %c0_1 = arith.constant 0 : index
    %3 = vector.load %arg2[%c1, %c0_1] : memref<8x128xf32, #tpu.memory_space<vmem>>, vector<1x128xf32>
    %cst_2 = arith.constant 3.125000e-02 : f32
    %4 = vector.broadcast %cst_2 : f32 to vector<1x128xf32>
    %5 = arith.mulf %3, %4 : vector<1x128xf32>
    %6 = arith.mulf %2, %2 : vector<1x128xf32>
    %7 = arith.subf %5, %6 : vector<1x128xf32>
    %cst_3 = arith.constant 0.000000e+00 : f32
    %8 = vector.broadcast %cst_3 : f32 to vector<1x128xf32>
    %9 = arith.maximumf %7, %8 : vector<1x128xf32>
    %c0_4 = arith.constant 0 : index
    %c0_5 = arith.constant 0 : index
    %10 = vector.load %arg3[%c0_4, %c0_5] : memref<1x128xf32, #tpu.memory_space<vmem>>, vector<1x128xf32>
    %cst_6 = arith.constant 9.99999974E-6 : f32
    %11 = vector.broadcast %cst_6 : f32 to vector<1x128xf32>
    %12 = arith.addf %9, %11 : vector<1x128xf32>
    %13 = math.rsqrt %12 : vector<1x128xf32>
    %14 = arith.mulf %10, %13 : vector<1x128xf32>
    %c0_7 = arith.constant 0 : index
    %c0_8 = arith.constant 0 : index
    %15 = vector.load %arg4[%c0_7, %c0_8] : memref<1x128xf32, #tpu.memory_space<vmem>>, vector<1x128xf32>
    %16 = arith.mulf %2, %14 : vector<1x128xf32>
    %17 = arith.subf %15, %16 : vector<1x128xf32>
    %c0_9 = arith.constant 0 : index
    %c0_10 = arith.constant 0 : index
    %18 = vector.load %arg1[%c0_9, %c0_10] : memref<32x128xf32, #tpu.memory_space<vmem>>, vector<32x128xf32>
    %19 = vector.broadcast %14 : vector<1x128xf32> to vector<32x128xf32>
    %20 = arith.mulf %18, %19 : vector<32x128xf32>
    %21 = vector.broadcast %17 : vector<1x128xf32> to vector<32x128xf32>
    %22 = arith.addf %20, %21 : vector<32x128xf32>
    %cst_11 = arith.constant 0.000000e+00 : f32
    %23 = vector.broadcast %cst_11 : f32 to vector<32x128xf32>
    %24 = arith.maximumf %22, %23 : vector<32x128xf32>
    %c0_12 = arith.constant 0 : index
    %c0_13 = arith.constant 0 : index
    %25 = vector.load %arg5[%c0_12, %c0_13] : memref<32x128xf32, #tpu.memory_space<vmem>>, vector<32x128xf32>
    tpu.vector_store %arg5[%c0_12, %c0_13], %24 {strides = array<i32>} : memref<32x128xf32, #tpu.memory_space<vmem>>, vector<32x128xf32>,
    return
  }
  func.func @transform_0(%arg0: i32) -> (i32, i32) {
    %c0_i32 = arith.constant 0 : i32
    %c0_i32_0 = arith.constant 0 : i32
    return %arg0, %c0_i32 : i32, i32
  }
  func.func @transform_1(%arg0: i32) -> (i32, i32) {
    %c0_i32 = arith.constant 0 : i32
    %c0_i32_0 = arith.constant 0 : i32
    %c0_i32_1 = arith.constant 0 : i32
    return %c0_i32, %c0_i32_0 : i32, i32
  }
  func.func @transform_2(%arg0: i32) -> (i32, i32) {
    %c0_i32 = arith.constant 0 : i32
    %c0_i32_0 = arith.constant 0 : i32
    %c0_i32_1 = arith.constant 0 : i32
    return %c0_i32, %c0_i32_0 : i32, i32
  }
  func.func @transform_3(%arg0: i32) -> (i32, i32) {
    %c0_i32 = arith.constant 0 : i32
    %c0_i32_0 = arith.constant 0 : i32
    %c0_i32_1 = arith.constant 0 : i32
    return %c0_i32, %c0_i32_0 : i32, i32
  }
  func.func @transform_4(%arg0: i32) -> (i32, i32) {
    %c0_i32 = arith.constant 0 : i32
    %c0_i32_0 = arith.constant 0 : i32
    return %arg0, %c0_i32 : i32, i32
  }
}

module attributes {stable_mosaic.version = 11 : i64} {
  func.func @_bn_relu_kernel(%arg0: i32, %arg1: memref<128x128xf32, #tpu.memory_space<vmem>>, %arg2: memref<8x128xf32, #tpu.memory_space<vmem>>, %arg3: memref<1x128xf32, #tpu.memory_space<vmem>>, %arg4: memref<1x128xf32, #tpu.memory_space<vmem>>, %arg5: memref<128x128xf32, #tpu.memory_space<vmem>>) attributes {dimension_semantics = [#tpu.dimension_semantics<parallel>], iteration_bounds = array<i64: 1>, scalar_prefetch = 0 : i64, scratch_operands = 0 : i64, tpu.core_type = #tpu.core_type<tc>, window_params = [{transform_indices = @transform_0, window_bounds = array<i64: 128, 128>}, {pipeline_mode = #tpu.pipeline_mode<synchronous>, transform_indices = @transform_1, window_bounds = array<i64: 8, 128>}, {pipeline_mode = #tpu.pipeline_mode<synchronous>, transform_indices = @transform_2, window_bounds = array<i64: 1, 128>}, {pipeline_mode = #tpu.pipeline_mode<synchronous>, transform_indices = @transform_3, window_bounds = array<i64: 1, 128>}, {transform_indices = @transform_4, window_bounds = array<i64: 128, 128>}]} {
    %c0 = arith.constant 0 : index
    %c0_0 = arith.constant 0 : index
    %0 = vector.load %arg2[%c0, %c0_0] : memref<8x128xf32, #tpu.memory_space<vmem>>, vector<1x128xf32>
    %cst = arith.constant 7.812500e-03 : f32
    %1 = vector.broadcast %cst : f32 to vector<1x128xf32>
    %2 = arith.mulf %0, %1 : vector<1x128xf32>
    %c1 = arith.constant 1 : index
    %c0_1 = arith.constant 0 : index
    %3 = vector.load %arg2[%c1, %c0_1] : memref<8x128xf32, #tpu.memory_space<vmem>>, vector<1x128xf32>
    %cst_2 = arith.constant 7.812500e-03 : f32
    %4 = vector.broadcast %cst_2 : f32 to vector<1x128xf32>
    %5 = arith.mulf %3, %4 : vector<1x128xf32>
    %6 = arith.mulf %2, %2 : vector<1x128xf32>
    %7 = arith.subf %5, %6 : vector<1x128xf32>
    %cst_3 = arith.constant 0.000000e+00 : f32
    %8 = vector.broadcast %cst_3 : f32 to vector<1x128xf32>
    %9 = arith.maximumf %7, %8 : vector<1x128xf32>
    %c0_4 = arith.constant 0 : index
    %c0_5 = arith.constant 0 : index
    %10 = vector.load %arg3[%c0_4, %c0_5] : memref<1x128xf32, #tpu.memory_space<vmem>>, vector<1x128xf32>
    %cst_6 = arith.constant 9.99999974E-6 : f32
    %11 = vector.broadcast %cst_6 : f32 to vector<1x128xf32>
    %12 = arith.addf %9, %11 : vector<1x128xf32>
    %13 = math.rsqrt %12 : vector<1x128xf32>
    %14 = arith.mulf %10, %13 : vector<1x128xf32>
    %c0_7 = arith.constant 0 : index
    %c0_8 = arith.constant 0 : index
    %15 = vector.load %arg4[%c0_7, %c0_8] : memref<1x128xf32, #tpu.memory_space<vmem>>, vector<1x128xf32>
    %16 = arith.mulf %2, %14 : vector<1x128xf32>
    %17 = arith.subf %15, %16 : vector<1x128xf32>
    %c0_9 = arith.constant 0 : index
    %c0_10 = arith.constant 0 : index
    %18 = vector.load %arg1[%c0_9, %c0_10] : memref<128x128xf32, #tpu.memory_space<vmem>>, vector<128x128xf32>
    %19 = vector.broadcast %14 : vector<1x128xf32> to vector<128x128xf32>
    %20 = arith.mulf %18, %19 : vector<128x128xf32>
    %21 = vector.broadcast %17 : vector<1x128xf32> to vector<128x128xf32>
    %22 = arith.addf %20, %21 : vector<128x128xf32>
    %cst_11 = arith.constant 0.000000e+00 : f32
    %23 = vector.broadcast %cst_11 : f32 to vector<128x128xf32>
    %24 = arith.maximumf %22, %23 : vector<128x128xf32>
    %c0_12 = arith.constant 0 : index
    %c0_13 = arith.constant 0 : index
    %25 = vector.load %arg5[%c0_12, %c0_13] : memref<128x128xf32, #tpu.memory_space<vmem>>, vector<128x128xf32>
    tpu.vector_store %arg5[%c0_12, %c0_13], %24 {strides = array<i32>} : memref<128x128xf32, #tpu.memory_space<vmem>>, vector<128x128xf32>,
    return
  }
  func.func @transform_0(%arg0: i32) -> (i32, i32) {
    %c0_i32 = arith.constant 0 : i32
    %c0_i32_0 = arith.constant 0 : i32
    return %arg0, %c0_i32 : i32, i32
  }
  func.func @transform_1(%arg0: i32) -> (i32, i32) {
    %c0_i32 = arith.constant 0 : i32
    %c0_i32_0 = arith.constant 0 : i32
    %c0_i32_1 = arith.constant 0 : i32
    return %c0_i32, %c0_i32_0 : i32, i32
  }
  func.func @transform_2(%arg0: i32) -> (i32, i32) {
    %c0_i32 = arith.constant 0 : i32
    %c0_i32_0 = arith.constant 0 : i32
    %c0_i32_1 = arith.constant 0 : i32
    return %c0_i32, %c0_i32_0 : i32, i32
  }
  func.func @transform_3(%arg0: i32) -> (i32, i32) {
    %c0_i32 = arith.constant 0 : i32
    %c0_i32_0 = arith.constant 0 : i32
    %c0_i32_1 = arith.constant 0 : i32
    return %c0_i32, %c0_i32_0 : i32, i32
  }
  func.func @transform_4(%arg0: i32) -> (i32, i32) {
    %c0_i32 = arith.constant 0 : i32
    %c0_i32_0 = arith.constant 0 : i32
    return %arg0, %c0_i32 : i32, i32
  }
}

module attributes {stable_mosaic.version = 11 : i64} {
  func.func @_gemm_kernel(%arg0: i32, %arg1: i32, %arg2: i32, %arg3: memref<128x128xbf16, #tpu.memory_space<vmem>>, %arg4: memref<128x128xbf16, #tpu.memory_space<vmem>>, %arg5: memref<128x128xf32, #tpu.memory_space<vmem>>, %arg6: memref<128x128xf32, #tpu.memory_space<vmem>>) attributes {dimension_semantics = [#tpu.dimension_semantics<parallel>, #tpu.dimension_semantics<parallel>, #tpu.dimension_semantics<arbitrary>], iteration_bounds = array<i64: 1, 1, 1>, scalar_prefetch = 0 : i64, scratch_operands = 1 : i64, tpu.core_type = #tpu.core_type<tc>, window_params = [{transform_indices = @transform_0, window_bounds = array<i64: 128, 128>}, {transform_indices = @transform_1, window_bounds = array<i64: 128, 128>}, {transform_indices = @transform_2, window_bounds = array<i64: 128, 128>}]} {
    %c0_i32 = arith.constant 0 : i32
    %0 = arith.cmpi eq, %arg2, %c0_i32 : i32
    %1 = arith.extui %0 : i1 to i32
    %c0_i32_0 = arith.constant 0 : i32
    %2 = arith.cmpi ne, %1, %c0_i32_0 : i32
    scf.if %2 {
      %cst_10 = arith.constant 0.000000e+00 : f32
      %12 = vector.broadcast %cst_10 : f32 to vector<128x128xf32>
      %c0_11 = arith.constant 0 : index
      %c0_12 = arith.constant 0 : index
      %13 = vector.load %arg6[%c0_11, %c0_12] : memref<128x128xf32, #tpu.memory_space<vmem>>, vector<128x128xf32>
      tpu.vector_store %arg6[%c0_11, %c0_12], %12 {strides = array<i32>} : memref<128x128xf32, #tpu.memory_space<vmem>>, vector<128x128xf32>,
    } else {
    }
    %c0 = arith.constant 0 : index
    %c0_1 = arith.constant 0 : index
    %3 = vector.load %arg6[%c0, %c0_1] : memref<128x128xf32, #tpu.memory_space<vmem>>, vector<128x128xf32>
    %c0_2 = arith.constant 0 : index
    %c0_3 = arith.constant 0 : index
    %4 = vector.load %arg3[%c0_2, %c0_3] : memref<128x128xbf16, #tpu.memory_space<vmem>>, vector<128x128xbf16>
    %c0_4 = arith.constant 0 : index
    %c0_5 = arith.constant 0 : index
    %5 = vector.load %arg4[%c0_4, %c0_5] : memref<128x128xbf16, #tpu.memory_space<vmem>>, vector<128x128xbf16>
    %cst = arith.constant dense<0.000000e+00> : vector<128x128xf32>
    %6 = tpu.matmul %4, %5, %cst {dimension_numbers = #tpu.dot_dimension_numbers<[1], [0], [0], [1], [0, 0, 1, 1], [], []>} : vector<128x128xbf16>, vector<128x128xbf16>, vector<128x128xf32> -> vector<128x128xf32>
    %7 = arith.addf %3, %6 : vector<128x128xf32>
    %c0_6 = arith.constant 0 : index
    %c0_7 = arith.constant 0 : index
    %8 = vector.load %arg6[%c0_6, %c0_7] : memref<128x128xf32, #tpu.memory_space<vmem>>, vector<128x128xf32>
    tpu.vector_store %arg6[%c0_6, %c0_7], %7 {strides = array<i32>} : memref<128x128xf32, #tpu.memory_space<vmem>>, vector<128x128xf32>,
    %c0_i32_8 = arith.constant 0 : i32
    %9 = arith.cmpi eq, %arg2, %c0_i32_8 : i32
    %10 = arith.extui %9 : i1 to i32
    %c0_i32_9 = arith.constant 0 : i32
    %11 = arith.cmpi ne, %10, %c0_i32_9 : i32
    scf.if %11 {
      %c0_10 = arith.constant 0 : index
      %c0_11 = arith.constant 0 : index
      %12 = vector.load %arg6[%c0_10, %c0_11] : memref<128x128xf32, #tpu.memory_space<vmem>>, vector<128x128xf32>
      %c0_12 = arith.constant 0 : index
      %c0_13 = arith.constant 0 : index
      %13 = vector.load %arg5[%c0_12, %c0_13] : memref<128x128xf32, #tpu.memory_space<vmem>>, vector<128x128xf32>
      tpu.vector_store %arg5[%c0_12, %c0_13], %12 {strides = array<i32>} : memref<128x128xf32, #tpu.memory_space<vmem>>, vector<128x128xf32>,
    } else {
    }
    return
  }
  func.func @transform_0(%arg0: i32, %arg1: i32, %arg2: i32) -> (i32, i32) {
    %c0_i32 = arith.constant 0 : i32
    return %arg0, %arg2 : i32, i32
  }
  func.func @transform_1(%arg0: i32, %arg1: i32, %arg2: i32) -> (i32, i32) {
    %c0_i32 = arith.constant 0 : i32
    return %arg2, %arg1 : i32, i32
  }
  func.func @transform_2(%arg0: i32, %arg1: i32, %arg2: i32) -> (i32, i32) {
    %c0_i32 = arith.constant 0 : i32
    return %arg0, %arg1 : i32, i32
  }
}

</mosaic_0001>

<bundles_post_ra>
// kernel: dcgan_g_forward.11
= control target key start
LH: loop header
LB: loop body
LE: loop exit
PB: predicated region body
PF: predicated region fallthrough
CT: control target
= control target key end

     0   :  { %v196_v27 = vlaneseq  ;;  %s326_s1 = inlined_call_operand.vmem [shape: bf16[128,128], index: 1, kind: input, shape index: {}]   ;;  %s327_s0 = inlined_call_operand.vmem [shape: bf16[32,128], index: 0, kind: input, shape index: {}]   ;;  %s328_s2 = inlined_call_operand.vmem [shape: f32[32,128], index: 2, kind: output, shape index: {0}]   ;;  %s329_s3 = inlined_call_operand.vmem [shape: f32[8,128], index: 3, kind: output, shape index: {1}]  }
   0x1   :  { %v251_v0 = vld [vmem:[%s326_s1] sm:$0xff]   ;;  %v252_v1 = vld [vmem:[%s326_s1 + $0x8] sm:$0xff]   ;;  %v253_v2 = vld [vmem:[%s326_s1 + $0x10] sm:$0xff]  }
   0x2   :  { %231 = vmatprep.subr.bf16.mxu0 %v251_v0  ;;  %v254_v3 = vld [vmem:[%s326_s1 + $0x18] sm:$0xff]   ;;  %v259_v4 = vld [vmem:[%s327_s0] sm:$0xff]   ;;  %v256_v6 = vld [vmem:[%s326_s1 + $0x28] sm:$0xff]   ;;  %v197_v32 = vshrl.u32 %v196_v27, 7 }
   0x3   :  { %232 = vmatpush3.bf16.msra.mxu0 %v251_v0  ;;  %247 = vmatprep.mubr.bf16.mxu0 %v259_v4  ;;  %v255_v5 = vld [vmem:[%s326_s1 + $0x20] sm:$0xff]   ;;  %v257_v7 = vld [vmem:[%s326_s1 + $0x30] sm:$0xff]   ;;  %v258_v8 = vld [vmem:[%s326_s1 + $0x38] sm:$0xff]  }
   0x4   :  { %233 = vmatprep.subr.bf16.mxu0 %v252_v1  ;;  %v260_v9 = vld [vmem:[%s327_s0 + $0x8] sm:$0xff]   ;;  %vm199_vm0 = vcmp.eq.s32.totalorder %v197_v32, 1  ;;  %vm198_vm1 = vcmp.eq.s32.totalorder %v197_v32, 0 }
   0x7   :  { %234 = vmatpush3.bf16.msra.mxu0 %v252_v1 }
   0x8   :  { %235 = vmatprep.subr.bf16.mxu0 %v253_v2 }
   0xb   :  { %236 = vmatpush3.bf16.msra.mxu0 %v253_v2 }
   0xc   :  { %237 = vmatprep.subr.bf16.mxu0 %v254_v3 }
   0xf   :  { %238 = vmatpush3.bf16.msra.mxu0 %v254_v3 }
  0x10   :  { %239 = vmatprep.subr.bf16.mxu0 %v255_v5 }
  0x13   :  { %240 = vmatpush3.bf16.msra.mxu0 %v255_v5 }
  0x14   :  { %241 = vmatprep.subr.bf16.mxu0 %v256_v6 }
  0x17   :  { %242 = vmatpush3.bf16.msra.mxu0 %v256_v6 }
  0x18   :  { %243 = vmatprep.subr.bf16.mxu0 %v257_v7 }
  0x1b   :  { %244 = vmatpush3.bf16.msra.mxu0 %v257_v7 }
  0x1c   :  { %245 = vmatprep.subr.bf16.mxu0 %v258_v8 }
  0x1f   :  { %246 = vmatpush3.bf16.msra.mxu0 %v258_v8 }
  0x22   :  { %248 = vmatmul.mubr.bf16.vlgmr.msra.gmra.mrb[0].mxu0 %v260_v9 }
  0xf5   :  { %v249_v10 = vpop.f32.mrb[0].mxu0 }
  0xf6   :  { %172 = vst [vmem:[%s328_s2 + $0x10] sm:$0xff] %v249_v10  ;;  %v140_v11 = vpop.f32.mrb[1].mxu0  ;;  %v185_v17 = vmul.f32 %v249_v10, %v249_v10 }
  0xf7   :  { %170 = vst [vmem:[%s328_s2] sm:$0xff] %v140_v11  ;;  %v250_v12 = vpop.f32.mrb[2].mxu0  ;;  %v183_v14 = vmul.f32 %v140_v11, %v140_v11 }
  0xf8   :  { %173 = vst [vmem:[%s328_s2 + $0x18] sm:$0xff] %v250_v12  ;;  %v143_v13 = vpop.f32.mrb[3].mxu0  ;;  %v186_v20 = vmul.f32 %v250_v12, %v250_v12 }
  0xf9   :  { %171 = vst [vmem:[%s328_s2 + $0x8] sm:$0xff] %v143_v13  ;;  %v174_v15 = vadd.f32 %v143_v13, %v140_v11  ;;  %v184_v16 = vmul.f32 %v143_v13, %v143_v13 }
  0xfb   :  { %v175_v18 = vadd.f32 %v249_v10, %v174_v15  ;;  %v187_v19 = vadd.f32 %v184_v16, %v183_v14 }
  0xfd   :  { %v176_v21 = vadd.f32 %v250_v12, %v175_v18  ;;  %v188_v22 = vadd.f32 %v187_v19, %v185_v17 }
  0xff   :  { %v177_v23 = vrot.slane %v176_v21, 4  ;;  %v189_v24 = vadd.f32 %v188_v22, %v186_v20 }
 0x101   :  { %v178_v25 = vadd.f32 %v177_v23, %v176_v21  ;;  %v190_v26 = vrot.slane %v189_v24, 4 }
 0x103   :  { %v179_v28 = vrot.slane %v178_v25, 2  ;;  %v191_v29 = vadd.f32 %v190_v26, %v189_v24 }
 0x105   :  { %v180_v30 = vadd.f32 %v179_v28, %v178_v25  ;;  %v192_v31 = vrot.slane %v191_v29, 2 }
 0x107   :  { %v193_v33 = vadd.f32 %v192_v31, %v191_v29  ;;  %v181_v34 = vrot.slane %v180_v30, 1 }
 0x109   :  { %v194_v35 = vrot.slane %v193_v33, 1  ;;  %v182_v37 = vadd.f32 %v181_v34, %v180_v30 }
 0x10b   :  { %v195_v36 = vadd.f32 %v194_v35, %v193_v33 }
 0x10d   :  { %v200_v38 = vsel %vm199_vm0, %v195_v36, 0.0 }
 0x10e   :  { %v201_v39 = vsel %vm198_vm1, %v182_v37, %v200_v38 }
 0x10f   :  { %202 = vst [vmem:[%s329_s3] sm:$0xff] %v201_v39 }

// kernel: dcgan_g_forward.12
= control target key start
LH: loop header
LB: loop body
LE: loop exit
PB: predicated region body
PF: predicated region fallthrough
CT: control target
= control target key end

     0   :  { %v36_v8 = vlaneseq  ;;  %s130_s1 = inlined_call_operand.vmem [shape: f32[8,128], index: 1, kind: input, shape index: {}]   ;;  %s131_s2 = inlined_call_operand.vmem [shape: f32[1,128], index: 2, kind: input, shape index: {}]   ;;  %s132_s3 = inlined_call_operand.vmem [shape: f32[1,128], index: 3, kind: input, shape index: {}]   ;;  %s133_s0 = inlined_call_operand.vmem [shape: f32[32,128], index: 0, kind: input, shape index: {}]   ;;  %s134_s4 = inlined_call_operand.vmem [shape: f32[32,128], index: 4, kind: output, shape index: {}]  }
   0x1   :  { %v17_v0 = vld [vmem:[%s130_s1] sm:$0x1]  ;;  %v19_v1 = vld [vmem:[%s130_s1 + $0x1] sm:$0x1]  ;;  %v32_v16 = vld [vmem:[%s133_s0 + $0x8] sm:$0xff] }
   0x2   :  { %v18_v2 = vmul.f32 0.03125, %v17_v0  ;;  %v20_v3 = vmul.f32 0.03125, %v19_v1  ;;  %v37_v9 = vshrl.u32 %v36_v8, 7  ;;  %v24_v10 = vld [vmem:[%s131_s2] sm:$0x1]  ;;  %v33_v17 = vld [vmem:[%s133_s0 + $0x10] sm:$0xff] }
   0x3   :  { %v28_v14 = vld [vmem:[%s132_s3] sm:$0x1]  ;;  %v34_v20 = vld [vmem:[%s133_s0 + $0x18] sm:$0xff] }
   0x4   :  { %v21_v4 = vmul.f32 %v18_v2, %v18_v2  ;;  %v38_v11 = vsub.s32 0, %v37_v9  ;;  %v31_v15 = vld [vmem:[%s133_s0] sm:$0xff] }
   0x6   :  { %v22_v5 = vsub.f32 %v20_v3, %v21_v4 }
   0x8   :  { %v23_v6 = vmax.f32 %v22_v5, 0.0 }
   0xa   :  { %v25_v7 = vadd.f32 1e-05, %v23_v6 }
   0xc   :  { %67 = vrsqrt.f32 %v25_v7 }
  0x16   :  { %v68_v12 = vpop.eup %67 }
  0x17   :  { %v27_v13 = vmul.f32 %v68_v12, %v24_v10 }
  0x19   :  { %v29_v18 = vmul.f32 %v27_v13, %v18_v2  ;;  %v39_v19 = vrot.slane %v27_v13, %v38_v11 }
  0x1b   :  { %v30_v21 = vsub.f32 %v28_v14, %v29_v18  ;;  %v41_v22 = vmul.f32 %v39_v19, %v31_v15  ;;  %v42_v23 = vmul.f32 %v39_v19, %v32_v16  ;;  %v43_v24 = vmul.f32 %v39_v19, %v33_v17 }
  0x1c   :  { %v44_v25 = vmul.f32 %v39_v19, %v34_v20 }
  0x1d   :  { %v49_v26 = vrot.slane %v30_v21, %v38_v11 }
  0x1f   :  { %v51_v27 = vadd.f32 %v49_v26, %v41_v22  ;;  %v52_v28 = vadd.f32 %v49_v26, %v42_v23  ;;  %v53_v29 = vadd.f32 %v49_v26, %v43_v24  ;;  %v54_v30 = vadd.f32 %v49_v26, %v44_v25 }
  0x21   :  { %v55_v31 = vmax.f32 %v51_v27, 0.0  ;;  %v56_v32 = vmax.f32 %v52_v28, 0.0  ;;  %v57_v33 = vmax.f32 %v53_v29, 0.0  ;;  %v58_v34 = vmax.f32 %v54_v30, 0.0 }
  0x23   :  { %59 = vst [vmem:[%s134_s4] sm:$0xff] %v55_v31  ;;  %60 = vst [vmem:[%s134_s4 + $0x8] sm:$0xff] %v56_v32 }
  0x24   :  { %61 = vst [vmem:[%s134_s4 + $0x10] sm:$0xff] %v57_v33  ;;  %62 = vst [vmem:[%s134_s4 + $0x18] sm:$0xff] %v58_v34 }

// kernel: dcgan_g_forward.17
= control target key start
LH: loop header
LB: loop body
LE: loop exit
PB: predicated region body
PF: predicated region fallthrough
CT: control target
= control target key end

     0   :  { %v48_v8 = vlaneseq  ;;  %s262_s1 = inlined_call_operand.vmem [shape: f32[8,128], index: 1, kind: input, shape index: {}]   ;;  %s263_s2 = inlined_call_operand.vmem [shape: f32[1,128], index: 2, kind: input, shape index: {}]   ;;  %s264_s0 = inlined_call_operand.vmem [shape: f32[128,128], index: 0, kind: input, shape index: {}]   ;;  %s265_s3 = inlined_call_operand.vmem [shape: f32[1,128], index: 3, kind: input, shape index: {}]   ;;  %s266_s4 = inlined_call_operand.vmem [shape: f32[128,128], index: 4, kind: output, shape index: {}]  }
   0x1   :  { %v17_v0 = vld [vmem:[%s262_s1] sm:$0x1]  ;;  %v19_v1 = vld [vmem:[%s262_s1 + $0x1] sm:$0x1]  ;;  %v32_v16 = vld [vmem:[%s264_s0 + $0x8] sm:$0xff] }
   0x2   :  { %v18_v2 = vmul.f32 0.0078125, %v17_v0  ;;  %v20_v3 = vmul.f32 0.0078125, %v19_v1  ;;  %v49_v9 = vshrl.u32 %v48_v8, 7  ;;  %v24_v10 = vld [vmem:[%s263_s2] sm:$0x1]  ;;  %v33_v17 = vld [vmem:[%s264_s0 + $0x10] sm:$0xff] }
   0x3   :  { %v28_v14 = vld [vmem:[%s265_s3] sm:$0x1]  ;;  %v34_v18 = vld [vmem:[%s264_s0 + $0x18] sm:$0xff]  ;;  %v36_v22 = vld [vmem:[%s264_s0 + $0x28] sm:$0xff] }
   0x4   :  { %v21_v4 = vmul.f32 %v18_v2, %v18_v2  ;;  %v50_v11 = vsub.s32 0, %v49_v9  ;;  %v31_v15 = vld [vmem:[%s264_s0] sm:$0xff]  ;;  %v37_v23 = vld [vmem:[%s264_s0 + $0x30] sm:$0xff]  ;;  %v38_v24 = vld [vmem:[%s264_s0 + $0x38] sm:$0xff] }
   0x5   :  { %v35_v19 = vld [vmem:[%s264_s0 + $0x20] sm:$0xff]  ;;  %v40_v26 = vld [vmem:[%s264_s0 + $0x48] sm:$0xff]  ;;  %v41_v27 = vld [vmem:[%s264_s0 + $0x50] sm:$0xff] }
   0x6   :  { %v22_v5 = vsub.f32 %v20_v3, %v21_v4  ;;  %v39_v25 = vld [vmem:[%s264_s0 + $0x40] sm:$0xff]  ;;  %v42_v32 = vld [vmem:[%s264_s0 + $0x58] sm:$0xff]  ;;  %v44_v34 = vld [vmem:[%s264_s0 + $0x68] sm:$0xff] }
   0x7   :  { %v43_v33 = vld [vmem:[%s264_s0 + $0x60] sm:$0xff]  ;;  %v45_v59 = vld [vmem:[%s264_s0 + $0x70] sm:$0xff]  ;;  %v46_v60 = vld [vmem:[%s264_s0 + $0x78] sm:$0xff] }
   0x8   :  { %v23_v6 = vmax.f32 %v22_v5, 0.0 }
   0xa   :  { %v25_v7 = vadd.f32 1e-05, %v23_v6 }
   0xc   :  { %127 = vrsqrt.f32 %v25_v7 }
  0x16   :  { %v128_v12 = vpop.eup %127 }
  0x17   :  { %v27_v13 = vmul.f32 %v128_v12, %v24_v10 }
  0x19   :  { %v29_v20 = vmul.f32 %v27_v13, %v18_v2  ;;  %v51_v21 = vrot.slane %v27_v13, %v50_v11 }
  0x1b   :  { %v30_v28 = vsub.f32 %v28_v14, %v29_v20  ;;  %v53_v29 = vmul.f32 %v51_v21, %v31_v15  ;;  %v54_v30 = vmul.f32 %v51_v21, %v32_v16  ;;  %v55_v31 = vmul.f32 %v51_v21, %v33_v17 }
  0x1c   :  { %v56_v35 = vmul.f32 %v51_v21, %v34_v18  ;;  %v57_v36 = vmul.f32 %v51_v21, %v35_v19  ;;  %v58_v37 = vmul.f32 %v51_v21, %v36_v22  ;;  %v59_v38 = vmul.f32 %v51_v21, %v37_v23 }
  0x1d   :  { %v73_v39 = vrot.slane %v30_v28, %v50_v11  ;;  %v60_v40 = vmul.f32 %v51_v21, %v38_v24  ;;  %v61_v41 = vmul.f32 %v51_v21, %v39_v25  ;;  %v62_v42 = vmul.f32 %v51_v21, %v40_v26 }
  0x1e   :  { %v63_v43 = vmul.f32 %v51_v21, %v41_v27  ;;  %v64_v44 = vmul.f32 %v51_v21, %v42_v32  ;;  %v65_v45 = vmul.f32 %v51_v21, %v43_v33  ;;  %v66_v46 = vmul.f32 %v51_v21, %v44_v34 }
  0x1f   :  { %v75_v47 = vadd.f32 %v73_v39, %v53_v29  ;;  %v76_v48 = vadd.f32 %v73_v39, %v54_v30  ;;  %v77_v49 = vadd.f32 %v73_v39, %v55_v31  ;;  %v78_v50 = vadd.f32 %v73_v39, %v56_v35 }
  0x20   :  { %v79_v51 = vadd.f32 %v73_v39, %v57_v36  ;;  %v80_v52 = vadd.f32 %v73_v39, %v58_v37  ;;  %v81_v53 = vadd.f32 %v73_v39, %v59_v38  ;;  %v82_v54 = vadd.f32 %v73_v39, %v60_v40 }
  0x21   :  { %v91_v55 = vmax.f32 %v75_v47, 0.0  ;;  %v92_v56 = vmax.f32 %v76_v48, 0.0  ;;  %v93_v57 = vmax.f32 %v77_v49, 0.0  ;;  %v94_v58 = vmax.f32 %v78_v50, 0.0 }
  0x22   :  { %v95_v61 = vmax.f32 %v79_v51, 0.0  ;;  %v96_v62 = vmax.f32 %v80_v52, 0.0  ;;  %v97_v63 = vmax.f32 %v81_v53, 0.0  ;;  %v98_v0 = vmax.f32 %v82_v54, 0.0 }
  0x23   :  { %107 = vst [vmem:[%s266_s4] sm:$0xff] %v91_v55  ;;  %108 = vst [vmem:[%s266_s4 + $0x8] sm:$0xff] %v92_v56  ;;  %v83_v1 = vadd.f32 %v73_v39, %v61_v41  ;;  %v84_v2 = vadd.f32 %v73_v39, %v62_v42  ;;  %v85_v3 = vadd.f32 %v73_v39, %v63_v43 }
  0x24   :  { %109 = vst [vmem:[%s266_s4 + $0x10] sm:$0xff] %v93_v57  ;;  %110 = vst [vmem:[%s266_s4 + $0x18] sm:$0xff] %v94_v58  ;;  %v86_v4 = vadd.f32 %v73_v39, %v64_v44  ;;  %v87_v5 = vadd.f32 %v73_v39, %v65_v45  ;;  %v88_v6 = vadd.f32 %v73_v39, %v66_v46 }
  0x25   :  { %111 = vst [vmem:[%s266_s4 + $0x20] sm:$0xff] %v95_v61  ;;  %112 = vst [vmem:[%s266_s4 + $0x28] sm:$0xff] %v96_v62  ;;  %v67_v7 = vmul.f32 %v51_v21, %v45_v59  ;;  %v68_v8 = vmul.f32 %v51_v21, %v46_v60  ;;  %v99_v9 = vmax.f32 %v83_v1, 0.0  ;;  %v100_v10 = vmax.f32 %v84_v2, 0.0 }
  0x26   :  { %113 = vst [vmem:[%s266_s4 + $0x30] sm:$0xff] %v97_v63  ;;  %114 = vst [vmem:[%s266_s4 + $0x38] sm:$0xff] %v98_v0  ;;  %v101_v11 = vmax.f32 %v85_v3, 0.0  ;;  %v102_v12 = vmax.f32 %v86_v4, 0.0  ;;  %v103_v13 = vmax.f32 %v87_v5, 0.0  ;;  %v104_v14 = vmax.f32 %v88_v6, 0.0 }
  0x27   :  { %v89_v15 = vadd.f32 %v73_v39, %v67_v7  ;;  %v90_v16 = vadd.f32 %v73_v39, %v68_v8  ;;  %115 = vst [vmem:[%s266_s4 + $0x40] sm:$0xff] %v99_v9  ;;  %116 = vst [vmem:[%s266_s4 + $0x48] sm:$0xff] %v100_v10 }
  0x28   :  { %117 = vst [vmem:[%s266_s4 + $0x50] sm:$0xff] %v101_v11  ;;  %118 = vst [vmem:[%s266_s4 + $0x58] sm:$0xff] %v102_v12 }
  0x29   :  { %119 = vst [vmem:[%s266_s4 + $0x60] sm:$0xff] %v103_v13  ;;  %120 = vst [vmem:[%s266_s4 + $0x68] sm:$0xff] %v104_v14  ;;  %v105_v17 = vmax.f32 %v89_v15, 0.0  ;;  %v106_v18 = vmax.f32 %v90_v16, 0.0 }
  0x2b   :  { %121 = vst [vmem:[%s266_s4 + $0x70] sm:$0xff] %v105_v17  ;;  %122 = vst [vmem:[%s266_s4 + $0x78] sm:$0xff] %v106_v18 }

// kernel: dcgan_g_forward.18
= control target key start
LH: loop header
LB: loop body
LE: loop exit
PB: predicated region body
PF: predicated region fallthrough
CT: control target
= control target key end

     0   :  { %s551_s1 = inlined_call_operand.vmem [shape: bf16[128,128], index: 1, kind: input, shape index: {}]   ;;  %s552_s0 = inlined_call_operand.vmem [shape: bf16[128,128], index: 0, kind: input, shape index: {}]   ;;  %s553_s2 = inlined_call_operand.vmem [shape: f32[128,128], index: 2, kind: output, shape index: {}]  }
   0x1   :  { %v424_v0 = vld [vmem:[%s551_s1] sm:$0xff]   ;;  %v425_v1 = vld [vmem:[%s551_s1 + $0x8] sm:$0xff]   ;;  %v426_v2 = vld [vmem:[%s551_s1 + $0x10] sm:$0xff]  }
   0x2   :  { %376 = vmatprep.subr.bf16.mxu0 %v424_v0  ;;  %408 = vmatprep.subr.bf16.mxu1 %v424_v0  ;;  %v427_v3 = vld [vmem:[%s551_s1 + $0x18] sm:$0xff]   ;;  %v432_v4 = vld [vmem:[%s552_s0] sm:$0xff]   ;;  %v429_v7 = vld [vmem:[%s551_s1 + $0x28] sm:$0xff]  }
   0x3   :  { %377 = vmatpush3.bf16.msra.mxu0 %v424_v0  ;;  %416 = vmatpush3.bf16.msra.mxu1 %v424_v0  ;;  %v433_v5 = vld [vmem:[%s552_s0 + $0x20] sm:$0xff]   ;;  %v430_v8 = vld [vmem:[%s551_s1 + $0x30] sm:$0xff]   ;;  %v431_v9 = vld [vmem:[%s551_s1 + $0x38] sm:$0xff]  }
   0x4   :  { %378 = vmatprep.subr.bf16.mxu0 %v425_v1  ;;  %409 = vmatprep.subr.bf16.mxu1 %v425_v1  ;;  %v428_v6 = vld [vmem:[%s551_s1 + $0x20] sm:$0xff]   ;;  %v434_v10 = vld [vmem:[%s552_s0 + $0x8] sm:$0xff]   ;;  %v436_v12 = vld [vmem:[%s552_s0 + $0x10] sm:$0xff]  }
   0x5   :  { %392 = vmatprep.mubr.bf16.mxu0 %v432_v4  ;;  %400 = vmatprep.mubr.bf16.mxu1 %v433_v5  ;;  %v435_v11 = vld [vmem:[%s552_s0 + $0x28] sm:$0xff]   ;;  %v437_v13 = vld [vmem:[%s552_s0 + $0x30] sm:$0xff]   ;;  %v438_v14 = vld [vmem:[%s552_s0 + $0x18] sm:$0xff]  }
   0x6   :  { %v439_v15 = vld [vmem:[%s552_s0 + $0x38] sm:$0xff]  }
   0x7   :  { %379 = vmatpush3.bf16.msra.mxu0 %v425_v1  ;;  %417 = vmatpush3.bf16.msra.mxu1 %v425_v1 }
   0x8   :  { %380 = vmatprep.subr.bf16.mxu0 %v426_v2  ;;  %410 = vmatprep.subr.bf16.mxu1 %v426_v2 }
   0xb   :  { %381 = vmatpush3.bf16.msra.mxu0 %v426_v2  ;;  %418 = vmatpush3.bf16.msra.mxu1 %v426_v2 }
   0xc   :  { %382 = vmatprep.subr.bf16.mxu0 %v427_v3  ;;  %411 = vmatprep.subr.bf16.mxu1 %v427_v3 }
   0xf   :  { %383 = vmatpush3.bf16.msra.mxu0 %v427_v3  ;;  %419 = vmatpush3.bf16.msra.mxu1 %v427_v3 }
  0x10   :  { %384 = vmatprep.subr.bf16.mxu0 %v428_v6  ;;  %412 = vmatprep.subr.bf16.mxu1 %v428_v6 }
  0x13   :  { %385 = vmatpush3.bf16.msra.mxu0 %v428_v6  ;;  %420 = vmatpush3.bf16.msra.mxu1 %v428_v6 }
  0x14   :  { %386 = vmatprep.subr.bf16.mxu0 %v429_v7  ;;  %413 = vmatprep.subr.bf16.mxu1 %v429_v7 }
  0x17   :  { %387 = vmatpush3.bf16.msra.mxu0 %v429_v7  ;;  %421 = vmatpush3.bf16.msra.mxu1 %v429_v7 }
  0x18   :  { %388 = vmatprep.subr.bf16.mxu0 %v430_v8  ;;  %414 = vmatprep.subr.bf16.mxu1 %v430_v8 }
  0x1b   :  { %389 = vmatpush3.bf16.msra.mxu0 %v430_v8  ;;  %422 = vmatpush3.bf16.msra.mxu1 %v430_v8 }
  0x1c   :  { %390 = vmatprep.subr.bf16.mxu0 %v431_v9  ;;  %415 = vmatprep.subr.bf16.mxu1 %v431_v9 }
  0x1f   :  { %391 = vmatpush3.bf16.msra.mxu0 %v431_v9  ;;  %423 = vmatpush3.bf16.msra.mxu1 %v431_v9 }
  0x22   :  { %393 = vmatmul.mubr.bf16.vlgmr.msra.gmra.mrb[0].mxu0 %v434_v10  ;;  %401 = vmatmul.mubr.bf16.vlgmr.msra.gmra.mrb[0].mxu1 %v435_v11 }
  0x23   :  { %396 = vmatprep.mubr.bf16.mxu0 %v436_v12  ;;  %404 = vmatprep.mubr.bf16.mxu1 %v437_v13 }
  0x2a   :  { %397 = vmatmul.mubr.bf16.gmra.mrb[4].mxu0 %v438_v14  ;;  %405 = vmatmul.mubr.bf16.gmra.mrb[4].mxu1 %v439_v15 }
  0xf5   :  { %v394_v16 = vpop.f32.mrb[0].mxu0  ;;  %v402_v17 = vpop.f32.mrb[0].mxu1 }
  0xf6   :  { %326 = vst [vmem:[%s553_s2 + $0x10] sm:$0xff] %v394_v16  ;;  %334 = vst [vmem:[%s553_s2 + $0x50] sm:$0xff] %v402_v17  ;;  %v210_v18 = vpop.f32.mrb[1].mxu0  ;;  %v242_v19 = vpop.f32.mrb[1].mxu1 }
  0xf7   :  { %324 = vst [vmem:[%s553_s2] sm:$0xff] %v210_v18  ;;  %332 = vst [vmem:[%s553_s2 + $0x40] sm:$0xff] %v242_v19  ;;  %v395_v20 = vpop.f32.mrb[2].mxu0  ;;  %v403_v21 = vpop.f32.mrb[2].mxu1 }
  0xf8   :  { %327 = vst [vmem:[%s553_s2 + $0x18] sm:$0xff] %v395_v20  ;;  %335 = vst [vmem:[%s553_s2 + $0x58] sm:$0xff] %v403_v21  ;;  %v213_v22 = vpop.f32.mrb[3].mxu0  ;;  %v245_v23 = vpop.f32.mrb[3].mxu1 }
  0xf9   :  { %325 = vst [vmem:[%s553_s2 + $0x8] sm:$0xff] %v213_v22  ;;  %333 = vst [vmem:[%s553_s2 + $0x48] sm:$0xff] %v245_v23 }
  0xfd   :  { %v398_v24 = vpop.f32.mrb[4].mxu0  ;;  %v406_v25 = vpop.f32.mrb[4].mxu1 }
  0xfe   :  { %330 = vst [vmem:[%s553_s2 + $0x30] sm:$0xff] %v398_v24  ;;  %338 = vst [vmem:[%s553_s2 + $0x70] sm:$0xff] %v406_v25  ;;  %v226_v26 = vpop.f32.mrb[5].mxu0  ;;  %v258_v27 = vpop.f32.mrb[5].mxu1 }
  0xff   :  { %328 = vst [vmem:[%s553_s2 + $0x20] sm:$0xff] %v226_v26  ;;  %336 = vst [vmem:[%s553_s2 + $0x60] sm:$0xff] %v258_v27  ;;  %v399_v28 = vpop.f32.mrb[6].mxu0  ;;  %v407_v29 = vpop.f32.mrb[6].mxu1 }
 0x100   :  { %331 = vst [vmem:[%s553_s2 + $0x38] sm:$0xff] %v399_v28  ;;  %339 = vst [vmem:[%s553_s2 + $0x78] sm:$0xff] %v407_v29  ;;  %v229_v30 = vpop.f32.mrb[7].mxu0  ;;  %v261_v31 = vpop.f32.mrb[7].mxu1 }
 0x101   :  { %329 = vst [vmem:[%s553_s2 + $0x28] sm:$0xff] %v229_v30  ;;  %337 = vst [vmem:[%s553_s2 + $0x68] sm:$0xff] %v261_v31 }

</bundles_post_ra>
